<compile_context>
chip_gen: v7x
topology: tpu7x:2x2x1
jax: 0.10.0
libtpu: 0.0.40
codegen_flags: <defaults>
</compile_context>

<pallas_src>
import functools

import jax
import jax.numpy as jnp
from jax.experimental import pallas as pl
from jax.experimental.pallas import tpu as pltpu


# ----------------------------- Pallas kernel --------------------------------

def _leaky_relu(h, neg_slope):
    # max(h, a*h) == leaky_relu(h, a) for 0 < a < 1; single VALU op.
    return jnp.maximum(h, neg_slope * h)


def _grouped_linear(x_by_type, etypes, w_ref, b_ref, src_idx):
    """XW_e = x[src(e)] @ W_e + b_e for every e in `etypes`.

    Etypes that share a source type are computed with ONE matmul whose weights/bias are
    concatenated along the output (lane) axis -> longer, lane-denser MXU ops.
    Returns {etype: [N, Fout] array}.
    """
    fout = w_ref.shape[-1]
    by_src = {}
    for e in etypes:
        by_src.setdefault(src_idx[e], []).append(e)
    out = {}
    for s in sorted(by_src):
        es = by_src[s]
        if len(es) == 1:
            e = es[0]
            out[e] = (jnp.dot(x_by_type[s], w_ref[e],
                              preferred_element_type=jnp.float32) + b_ref[e])
        else:
            w_cat = jnp.concatenate([w_ref[e] for e in es], axis=1)     # [Fin, k*Fout]
            b_cat = jnp.concatenate([b_ref[e] for e in es], axis=1)     # [1,   k*Fout]
            xw = jnp.dot(x_by_type[s], w_cat,
                         preferred_element_type=jnp.float32) + b_cat    # [N, k*Fout]
            for i, e in enumerate(es):
                out[e] = xw[:, i * fout:(i + 1) * fout]
    return out


def _merged_aggregate(adj_ref, etypes, xw):
    """sum_e A_e @ XW_e as ONE matmul: [A_e0 | A_e1 | ...] @ vstack(XW_e0, XW_e1, ...)."""
    if len(etypes) == 1:
        e = etypes[0]
        return jnp.dot(adj_ref[e], xw[e], preferred_element_type=jnp.float32)
    a_cat = jnp.concatenate([adj_ref[e] for e in etypes], axis=1)        # [N, k*N]
    x_cat = jnp.concatenate([xw[e] for e in etypes], axis=0)             # [k*N, Fout]
    return jnp.dot(a_cat, x_cat, preferred_element_type=jnp.float32)


def _fused_rgnn_kernel(feat_ref, adj_ref, w1_ref, b1_ref, w2_ref, b2_ref, o_ref,
                       *, src_idx, dst_idx, l1_etypes, l2_etypes, needed_l1_dst,
                       neg_slope):
    N = feat_ref.shape[1]
    Fh = w1_ref.shape[-1]

    # ---- layer 1: only destination types actually consumed by layer 2 ----
    l1_srcs = sorted({src_idx[e] for e in l1_etypes})
    feat_by_type = {s: feat_ref[s] for s in l1_srcs}
    xw1 = _grouped_linear(feat_by_type, l1_etypes, w1_ref, b1_ref, src_idx)

    h1 = {}
    for d in needed_l1_dst:
        es = [e for e in l1_etypes if dst_idx[e] == d]
        if es:
            h = _merged_aggregate(adj_ref, es, xw1)
        else:
            # TODO(synk): DGL would leave this node type's 'h' unset (KeyError downstream);
            # we feed zeros so the kernel stays total.  Unreachable with the demo etype set.
            h = jnp.zeros((N, Fh), jnp.float32)
        h1[d] = _leaky_relu(h, neg_slope)

    # ---- layer 2: the module only returns h['vul'], so only vul-destination etypes ----
    if l2_etypes:
        xw2 = _grouped_linear(h1, l2_etypes, w2_ref, b2_ref, src_idx)
        out = _merged_aggregate(adj_ref, l2_etypes, xw2)
    else:
        out = jnp.zeros(o_ref.shape, jnp.float32)
    o_ref[...] = _leaky_relu(out, neg_slope).astype(o_ref.dtype)


# --------------------------- HeteroRGNN wrapper ------------------------------

def hetero_rgnn_forward(feat, adj, W1, B1, W2, B2, *, src_idx, dst_idx, vul_idx,
                        neg_slope=0.01):
    """Two fused HeteroRGCNLayers (gnn_type='gcn') + leaky_relu, returning h['vul'].

    feat: [T, N, Fin]   per-node-type features (the nn.Parameter embed dict)
    adj:  [E, N, N]     per-etype row-normalized adjacency (dst x src)
    W1/B1: [E, Fin, Fh] / [E, 1, Fh];  W2/B2: [E, Fh, Fo] / [E, 1, Fo]
    src_idx / dst_idx: per-etype node-type indices (compile-time Python ints)
    returns: [N, Fo]  == leaky_relu(layer2(leaky_relu(layer1(feat))))['vul']
    """
    T, N, Fin = feat.shape
    E = adj.shape[0]
    Fh = W1.shape[-1]
    Fo = W2.shape[-1]

    src_idx = tuple(int(i) for i in src_idx)
    dst_idx = tuple(int(i) for i in dst_idx)
    vul_idx = int(vul_idx)

    # ---- static etype analysis (dead-work elimination, all at trace time) ----
    l2_etypes = tuple(e for e in range(E) if dst_idx[e] == vul_idx)
    needed_l1_dst = tuple(sorted({src_idx[e] for e in l2_etypes}))
    l1_etypes = tuple(e for e in range(E) if dst_idx[e] in needed_l1_dst)

    # ---- lane-dense output: pad Fo to a multiple of 128 with zero weight/bias columns ----
    lane = 128
    Fo_pad = int(pl.cdiv(Fo, lane)) * lane
    if Fo_pad != Fo:
        W2p = jnp.pad(W2, ((0, 0), (0, 0), (0, Fo_pad - Fo)))
        B2p = jnp.pad(B2, ((0, 0), (0, 0), (0, Fo_pad - Fo)))
    else:
        W2p, B2p = W2, B2

    kernel = functools.partial(
        _fused_rgnn_kernel,
        src_idx=src_idx, dst_idx=dst_idx,
        l1_etypes=l1_etypes, l2_etypes=l2_etypes, needed_l1_dst=needed_l1_dst,
        neg_slope=neg_slope)

    # ---- advisory cost estimate (reflects dead-work removal + matmul merging) ----
    def _groups(etypes, key):
        g = {}
        for e in etypes:
            g.setdefault(key[e], []).append(e)
        return g

    flops = 0
    for _, es in _groups(l1_etypes, src_idx).items():
        flops += 2 * N * Fin * (len(es) * Fh)                 # grouped X@W
    for _, es in _groups(l1_etypes, dst_idx).items():
        flops += 2 * N * (len(es) * N) * Fh                   # merged A@(XW)
    for _, es in _groups(l2_etypes, src_idx).items():
        flops += 2 * N * Fh * (len(es) * Fo_pad)
    if l2_etypes:
        flops += 2 * N * (len(l2_etypes) * N) * Fo_pad

    operand_bytes = 4 * (feat.size + adj.size + W1.size + B1.size
                         + W2p.size + B2p.size + N * Fo_pad)
    # Whole operands are VMEM-resident and single-buffered (no grid => no pipelining);
    # leave headroom for in-kernel concats/intermediates. Explicit limit so scaling N
    # doesn't silently hit the scoped default (16 MiB v5e / 32 MiB v6e,v7x).
    vmem_limit = int(min(64 * 2**20, max(8 * 2**20, 8 * operand_bytes)))

    out_pad = pl.pallas_call(
        kernel,
        out_shape=jax.ShapeDtypeStruct((N, Fo_pad), jnp.float32),
        in_specs=[pl.BlockSpec(memory_space=pltpu.MemorySpace.VMEM)] * 6,
        out_specs=pl.BlockSpec(memory_space=pltpu.MemorySpace.VMEM),
        compiler_params=pltpu.CompilerParams(vmem_limit_bytes=vmem_limit),
        cost_estimate=pl.CostEstimate(flops=int(flops), transcendentals=0,
                                      bytes_accessed=int(operand_bytes)),
    )(feat, adj, W1, B1, W2p, B2p)

    return out_pad[:, :Fo]


# ------------------------------ pure-JAX ref ---------------------------------

def _ref_layer(feat, adj, src_idx, dst_idx, W, B, neg_slope=0.01):
    T, N, _ = feat.shape
    Fout = W.shape[-1]
    out = jnp.zeros((T, N, Fout), jnp.float32)
    for e in range(adj.shape[0]):
        wh = feat[src_idx[e]] @ W[e] + B[e][0]
        out = out.at[dst_idx[e]].add(adj[e] @ wh)
    return jnp.where(out >= 0, out, neg_slope * out)


def _ref_forward(feat, adj, src_idx, dst_idx, params, vul_idx):
    (W1, B1), (W2, B2) = params
    h = _ref_layer(feat, adj, src_idx, dst_idx, W1, B1)
    h = _ref_layer(h,    adj, src_idx, dst_idx, W2, B2)
    return h[vul_idx]


# ----------------------------------- main ------------------------------------

if __name__ == "__main__":
    key = jax.random.PRNGKey(0)

    # Synthetic heterogeneous graph (matches the CVE-KG flavor of the module).
    ntypes = ["vul", "weakness_name", "vendor"]      # T = 3 node types
    T = len(ntypes)
    N = 16                                           # nodes per type
    in_size, hidden_size, out_size = 32, 64, 32

    canonical = [
        ("weakness_name", "weakness_of",  "vul"),
        ("vendor",        "vendor_of",    "vul"),
        ("vul",           "has_weakness", "weakness_name"),
        ("vul",           "has_vendor",   "vendor"),
    ]
    E = len(canonical)
    nt_id = {n: i for i, n in enumerate(ntypes)}
    src_idx = [nt_id[s] for s, _, _ in canonical]
    dst_idx = [nt_id[d] for _, _, d in canonical]

    # Node features (the nn.Parameter embed dict in HeteroRGNN.__init__).
    key, kf = jax.random.split(key)
    feat = jax.random.normal(kf, (T, N, in_size), dtype=jnp.float32)

    # Per-etype row-normalized adjacency (dst x src); zero rows for 0-in-degree nodes.
    adjs = []
    for e in range(E):
        key, ka = jax.random.split(key)
        a = (jax.random.uniform(ka, (N, N)) < 0.3).astype(jnp.float32)
        deg = a.sum(axis=1, keepdims=True)
        adjs.append(jnp.where(deg > 0, a / jnp.maximum(deg, 1.0), 0.0))
    adj = jnp.stack(adjs).astype(jnp.float32)        # [E, N, N]

    # Deterministic parameter init (two HeteroRGCNLayers: per-etype nn.Linear).
    def init_linear(k, fin, fout):
        kw, kb = jax.random.split(k)
        w = jax.random.normal(kw, (fin, fout), dtype=jnp.float32) * 0.1
        b = jax.random.normal(kb, (1, fout), dtype=jnp.float32) * 0.01
        return w, b

    def init_layer(k, fin, fout):
        ks = jax.random.split(k, E)
        ws, bs = zip(*(init_linear(ks[e], fin, fout) for e in range(E)))
        return jnp.stack(ws), jnp.stack(bs)          # [E,Fin,Fout], [E,1,Fout]

    key, k1, k2 = jax.random.split(key, 3)
    (W1, B1) = init_layer(k1, in_size, hidden_size)
    (W2, B2) = init_layer(k2, hidden_size, out_size)

    out = hetero_rgnn_forward(feat, adj, W1, B1, W2, B2,
                              src_idx=src_idx, dst_idx=dst_idx, vul_idx=nt_id["vul"])
    out = jax.block_until_ready(out)

    ref = _ref_forward(feat, adj, src_idx, dst_idx, ((W1, B1), (W2, B2)), nt_id["vul"])
    assert out.shape == (N, out_size)
    assert jnp.allclose(out, ref, atol=1e-4, rtol=1e-4)

    print("KERNEL_OK")
</pallas_src>

<mosaic_0001>
module attributes {stable_mosaic.version = 11 : i64} {
  func.func @_fused_rgnn_kernel(%arg0: memref<3x16x32xf32, #tpu.memory_space<vmem>>, %arg1: memref<4x16x16xf32, #tpu.memory_space<vmem>>, %arg2: memref<4x32x64xf32, #tpu.memory_space<vmem>>, %arg3: memref<4x1x64xf32, #tpu.memory_space<vmem>>, %arg4: memref<4x64x128xf32, #tpu.memory_space<vmem>>, %arg5: memref<4x1x128xf32, #tpu.memory_space<vmem>>, %arg6: memref<16x128xf32, #tpu.memory_space<vmem>>) attributes {dimension_semantics = [], scalar_prefetch = 0 : i64, scratch_operands = 0 : i64, tpu.core_type = #tpu.core_type<tc>} {
    %c0 = arith.constant 0 : index
    %c0_0 = arith.constant 0 : index
    %c0_1 = arith.constant 0 : index
    %0 = vector.load %arg0[%c0, %c0_0, %c0_1] : memref<3x16x32xf32, #tpu.memory_space<vmem>>, vector<1x16x32xf32>
    %1 = vector.shape_cast %0 : vector<1x16x32xf32> to vector<16x32xf32>
    %c2 = arith.constant 2 : index
    %c0_2 = arith.constant 0 : index
    %c0_3 = arith.constant 0 : index
    %2 = vector.load %arg2[%c2, %c0_2, %c0_3] : memref<4x32x64xf32, #tpu.memory_space<vmem>>, vector<1x32x64xf32>
    %3 = vector.shape_cast %2 : vector<1x32x64xf32> to vector<32x64xf32>
    %c3 = arith.constant 3 : index
    %c0_4 = arith.constant 0 : index
    %c0_5 = arith.constant 0 : index
    %4 = vector.load %arg2[%c3, %c0_4, %c0_5] : memref<4x32x64xf32, #tpu.memory_space<vmem>>, vector<1x32x64xf32>
    %5 = vector.shape_cast %4 : vector<1x32x64xf32> to vector<32x64xf32>
    %6 = tpu.concatenate %3, %5 in 1 : vector<32x64xf32>, vector<32x64xf32> -> vector<32x128xf32>
    %c2_6 = arith.constant 2 : index
    %c0_7 = arith.constant 0 : index
    %c0_8 = arith.constant 0 : index
    %7 = vector.load %arg3[%c2_6, %c0_7, %c0_8] : memref<4x1x64xf32, #tpu.memory_space<vmem>>, vector<1x1x64xf32>
    %8 = vector.shape_cast %7 : vector<1x1x64xf32> to vector<1x64xf32>
    %c3_9 = arith.constant 3 : index
    %c0_10 = arith.constant 0 : index
    %c0_11 = arith.constant 0 : index
    %9 = vector.load %arg3[%c3_9, %c0_10, %c0_11] : memref<4x1x64xf32, #tpu.memory_space<vmem>>, vector<1x1x64xf32>
    %10 = vector.shape_cast %9 : vector<1x1x64xf32> to vector<1x64xf32>
    %11 = tpu.concatenate %8, %10 in 1 : vector<1x64xf32>, vector<1x64xf32> -> vector<1x128xf32>
    %cst = arith.constant dense<0.000000e+00> : vector<16x128xf32>
    %12 = tpu.matmul %1, %6, %cst {dimension_numbers = #tpu.dot_dimension_numbers<[1], [0], [0], [1], [0, 0, 1, 1], [], []>} : vector<16x32xf32>, vector<32x128xf32>, vector<16x128xf32> -> vector<16x128xf32>
    %13 = vector.broadcast %11 : vector<1x128xf32> to vector<16x128xf32>
    %14 = arith.addf %12, %13 : vector<16x128xf32>
    %15 = vector.extract_strided_slice %14 {offsets = [0, 0], sizes = [16, 64], strides = [1, 1]} : vector<16x128xf32> to vector<16x64xf32>
    %16 = vector.extract_strided_slice %14 {offsets = [0, 64], sizes = [16, 64], strides = [1, 1]} : vector<16x128xf32> to vector<16x64xf32>
    %c2_12 = arith.constant 2 : index
    %c0_13 = arith.constant 0 : index
    %c0_14 = arith.constant 0 : index
    %17 = vector.load %arg1[%c2_12, %c0_13, %c0_14] : memref<4x16x16xf32, #tpu.memory_space<vmem>>, vector<1x16x16xf32>
    %18 = vector.shape_cast %17 : vector<1x16x16xf32> to vector<16x16xf32>
    %cst_15 = arith.constant dense<0.000000e+00> : vector<16x64xf32>
    %19 = tpu.matmul %18, %15, %cst_15 {dimension_numbers = #tpu.dot_dimension_numbers<[1], [0], [0], [1], [0, 0, 1, 1], [], []>} : vector<16x16xf32>, vector<16x64xf32>, vector<16x64xf32> -> vector<16x64xf32>
    %cst_16 = arith.constant 0.00999999977 : f32
    %20 = vector.broadcast %cst_16 : f32 to vector<16x64xf32>
    %21 = arith.mulf %20, %19 : vector<16x64xf32>
    %22 = arith.maximumf %19, %21 : vector<16x64xf32>
    %c3_17 = arith.constant 3 : index
    %c0_18 = arith.constant 0 : index
    %c0_19 = arith.constant 0 : index
    %23 = vector.load %arg1[%c3_17, %c0_18, %c0_19] : memref<4x16x16xf32, #tpu.memory_space<vmem>>, vector<1x16x16xf32>
    %24 = vector.shape_cast %23 : vector<1x16x16xf32> to vector<16x16xf32>
    %cst_20 = arith.constant dense<0.000000e+00> : vector<16x64xf32>
    %25 = tpu.matmul %24, %16, %cst_20 {dimension_numbers = #tpu.dot_dimension_numbers<[1], [0], [0], [1], [0, 0, 1, 1], [], []>} : vector<16x16xf32>, vector<16x64xf32>, vector<16x64xf32> -> vector<16x64xf32>
    %cst_21 = arith.constant 0.00999999977 : f32
    %26 = vector.broadcast %cst_21 : f32 to vector<16x64xf32>
    %27 = arith.mulf %26, %25 : vector<16x64xf32>
    %28 = arith.maximumf %25, %27 : vector<16x64xf32>
    %c0_22 = arith.constant 0 : index
    %c0_23 = arith.constant 0 : index
    %c0_24 = arith.constant 0 : index
    %29 = vector.load %arg4[%c0_22, %c0_23, %c0_24] : memref<4x64x128xf32, #tpu.memory_space<vmem>>, vector<1x64x128xf32>
    %30 = vector.shape_cast %29 : vector<1x64x128xf32> to vector<64x128xf32>
    %cst_25 = arith.constant dense<0.000000e+00> : vector<16x128xf32>
    %31 = tpu.matmul %22, %30, %cst_25 {dimension_numbers = #tpu.dot_dimension_numbers<[1], [0], [0], [1], [0, 0, 1, 1], [], []>} : vector<16x64xf32>, vector<64x128xf32>, vector<16x128xf32> -> vector<16x128xf32>
    %c0_26 = arith.constant 0 : index
    %c0_27 = arith.constant 0 : index
    %c0_28 = arith.constant 0 : index
    %32 = vector.load %arg5[%c0_26, %c0_27, %c0_28] : memref<4x1x128xf32, #tpu.memory_space<vmem>>, vector<1x1x128xf32>
    %33 = vector.shape_cast %32 : vector<1x1x128xf32> to vector<1x128xf32>
    %34 = vector.broadcast %33 : vector<1x128xf32> to vector<16x128xf32>
    %35 = arith.addf %31, %34 : vector<16x128xf32>
    %c1 = arith.constant 1 : index
    %c0_29 = arith.constant 0 : index
    %c0_30 = arith.constant 0 : index
    %36 = vector.load %arg4[%c1, %c0_29, %c0_30] : memref<4x64x128xf32, #tpu.memory_space<vmem>>, vector<1x64x128xf32>
    %37 = vector.shape_cast %36 : vector<1x64x128xf32> to vector<64x128xf32>
    %cst_31 = arith.constant dense<0.000000e+00> : vector<16x128xf32>
    %38 = tpu.matmul %28, %37, %cst_31 {dimension_numbers = #tpu.dot_dimension_numbers<[1], [0], [0], [1], [0, 0, 1, 1], [], []>} : vector<16x64xf32>, vector<64x128xf32>, vector<16x128xf32> -> vector<16x128xf32>
    %c1_32 = arith.constant 1 : index
    %c0_33 = arith.constant 0 : index
    %c0_34 = arith.constant 0 : index
    %39 = vector.load %arg5[%c1_32, %c0_33, %c0_34] : memref<4x1x128xf32, #tpu.memory_space<vmem>>, vector<1x1x128xf32>
    %40 = vector.shape_cast %39 : vector<1x1x128xf32> to vector<1x128xf32>
    %41 = vector.broadcast %40 : vector<1x128xf32> to vector<16x128xf32>
    %42 = arith.addf %38, %41 : vector<16x128xf32>
    %c0_35 = arith.constant 0 : index
    %c0_36 = arith.constant 0 : index
    %c0_37 = arith.constant 0 : index
    %43 = vector.load %arg1[%c0_35, %c0_36, %c0_37] : memref<4x16x16xf32, #tpu.memory_space<vmem>>, vector<1x16x16xf32>
    %44 = vector.shape_cast %43 : vector<1x16x16xf32> to vector<16x16xf32>
    %c1_38 = arith.constant 1 : index
    %c0_39 = arith.constant 0 : index
    %c0_40 = arith.constant 0 : index
    %45 = vector.load %arg1[%c1_38, %c0_39, %c0_40] : memref<4x16x16xf32, #tpu.memory_space<vmem>>, vector<1x16x16xf32>
    %46 = vector.shape_cast %45 : vector<1x16x16xf32> to vector<16x16xf32>
    %47 = tpu.concatenate %44, %46 in 1 : vector<16x16xf32>, vector<16x16xf32> -> vector<16x32xf32>
    %48 = tpu.concatenate %35, %42 in 0 : vector<16x128xf32>, vector<16x128xf32> -> vector<32x128xf32>
    %cst_41 = arith.constant dense<0.000000e+00> : vector<16x128xf32>
    %49 = tpu.matmul %47, %48, %cst_41 {dimension_numbers = #tpu.dot_dimension_numbers<[1], [0], [0], [1], [0, 0, 1, 1], [], []>} : vector<16x32xf32>, vector<32x128xf32>, vector<16x128xf32> -> vector<16x128xf32>
    %cst_42 = arith.constant 0.00999999977 : f32
    %50 = vector.broadcast %cst_42 : f32 to vector<16x128xf32>
    %51 = arith.mulf %50, %49 : vector<16x128xf32>
    %52 = arith.maximumf %49, %51 : vector<16x128xf32>
    %c0_43 = arith.constant 0 : index
    %c0_44 = arith.constant 0 : index
    %53 = vector.load %arg6[%c0_43, %c0_44] : memref<16x128xf32, #tpu.memory_space<vmem>>, vector<16x128xf32>
    tpu.vector_store %arg6[%c0_43, %c0_44], %52 {strides = array<i32>} : memref<16x128xf32, #tpu.memory_space<vmem>>, vector<16x128xf32>,
    return
  }
}

</mosaic_0001>

<bundles_post_ra>
// kernel: tpu_custom_call.1
= control target key start
LH: loop header
LB: loop body
LE: loop exit
PB: predicated region body
PF: predicated region fallthrough
CT: control target
= control target key end

     0   :  { %11 = vsyncpa [#allocation3], 0  ;;  %s1209_s0 = inlined_call_operand.hbm [shape: f32[3,16,32], index: 0, kind: input, shape index: {}]   ;;  %s1210_s1 = inlined_call_operand.hbm [shape: f32[4,16,16], index: 1, kind: input, shape index: {}]   ;;  %s1211_s2 = inlined_call_operand.hbm [shape: f32[4,32,64], index: 2, kind: input, shape index: {}]   ;;  %s1212_s3 = inlined_call_operand.vmem [shape: f32[4,1,64], index: 3, kind: input, shape index: {}]   ;;  %s1213_s4 = inlined_call_operand.hbm [shape: f32[4,64,128], index: 4, kind: input, shape index: {}]   ;;  %s1214_s5 = inlined_call_operand.vmem [shape: f32[4,1,128], index: 5, kind: input, shape index: {}]   ;;  %s1215_s6 = inlined_call_operand.hbm [shape: f32[16,128], index: 6, kind: output, shape index: {}]  }
   0x1   :  { %12 = vsyncpa [#allocation6], 0 }
   0x2   :  { %13 = vsyncpa [#allocation9], 0 }
   0x3   :  { %14 = vsyncpa [#allocation4], 0  ;;  %s1041_s21 = smov [#allocation5]   ;;  %s1042_s23 = smov [#allocation2]  }
   0x4   :  { %s32_s22 = sshll.u32 %s1041_s21, 4  ;;  %s20_s24 = sshll.u32 %s1042_s23, 4  ;;  %s33_s22 = int_to_ptr.vmem [resolvable:$true] %s32_s22  ;;  %s1085_s24 = int_to_ptr.vmem [resolvable:$true] %s20_s24 }
   0x5   :  { %s923_s27 = scalar_lea.hbm %s1210_s1, 1024 }
   0x6   :  { %p924_p0 = scmp.ne.s32.totalorder %s1210_s1, %s923_s27  ;;  %p927_p1 = scmp.lt.u32.totalorder %s923_s27, %s1210_s1 }
   0x8   :  { %p929_p2 = pnand %p927_p1, %p924_p0 }
   0xa   :  { %932 = shalt.err (!%p929_p2)
}
   0xb   :  { %s933_s8 = scalar_lea.vmem %s33_s22, 1024  ;;  %p938_p4 = scmp.lt.s32.totalorder %s33_s22, %s33_s22 }
   0xc   :  { %p934_p3 = scmp.ne.s32.totalorder %s33_s22, %s933_s8  ;;  %p939_p5 = scmp.lt.s32.totalorder %s933_s8, %s933_s8 }
   0xe   :  { %p940_p6 = por %p939_p5, %p938_p4 }
  0x10   :  { %p941_p7 = pnand %p940_p6, %p934_p3 }
  0x12   :  { %944 = shalt.err (!%p941_p7)
}
  0x13   :  { %s1043_s9 = smov 128   ;;  %s1044_s10 = smov 8  }
  0x14   :  { %38 = dma.hbm_to_vmem [thread:$0]  %s1210_s1, 1024, %s33_s22, [#allocation6], %s1043_s9, %s1043_s9, %s1044_s10  }
  0x15   :  { %s945_s15 = scalar_lea.hbm %s1209_s0, 768 }
  0x16   :  { %p946_p8 = scmp.ne.s32.totalorder %s1209_s0, %s945_s15  ;;  %p949_p9 = scmp.lt.u32.totalorder %s945_s15, %s1209_s0 }
  0x18   :  { %p951_p10 = pnand %p949_p9, %p946_p8 }
  0x1a   :  { %954 = shalt.err (!%p951_p10)
}
  0x1b   :  { %s955_s20 = scalar_lea.vmem %s1085_s24, 768  ;;  %p960_p12 = scmp.lt.s32.totalorder %s1085_s24, %s1085_s24 }
  0x1c   :  { %p956_p11 = scmp.ne.s32.totalorder %s1085_s24, %s955_s20  ;;  %p961_p13 = scmp.lt.s32.totalorder %s955_s20, %s955_s20 }
  0x1e   :  { %p962_p0 = por %p961_p13, %p960_p12 }
  0x20   :  { %p963_p1 = pnand %p962_p0, %p956_p11 }
  0x22   :  { %966 = shalt.err (!%p963_p1)
}
  0x23   :  { %26 = dma.hbm_to_vmem [thread:$0]  %s1209_s0, 768, %s1085_s24, [#allocation3], %s1043_s9, %s1043_s9, %s1044_s10  }
  0x24   :  { %s1045_s22 = smov [#allocation7]   ;;  %s1046_s25 = smov [#allocation8]  }
  0x25   :  { %s44_s23 = sshll.u32 %s1045_s22, 4  ;;  %s58_s26 = sshll.u32 %s1046_s25, 4  ;;  %s45_s23 = int_to_ptr.vmem [resolvable:$true] %s44_s23  ;;  %s1122_s26 = int_to_ptr.vmem [resolvable:$true] %s58_s26 }
  0x26   :  { %s967_s29 = scalar_lea.hbm %s1211_s2, 2048 }
  0x27   :  { %p968_p2 = scmp.ne.s32.totalorder %s1211_s2, %s967_s29  ;;  %p971_p3 = scmp.lt.u32.totalorder %s967_s29, %s1211_s2 }
  0x29   :  { %p973_p4 = pnand %p971_p3, %p968_p2 }
  0x2b   :  { %976 = shalt.err (!%p973_p4)
}
  0x2c   :  { %s977_s0 = scalar_lea.vmem %s45_s23, 2048  ;;  %p982_p6 = scmp.lt.s32.totalorder %s45_s23, %s45_s23 }
  0x2d   :  { %p978_p5 = scmp.ne.s32.totalorder %s45_s23, %s977_s0  ;;  %p983_p7 = scmp.lt.s32.totalorder %s977_s0, %s977_s0 }
  0x2f   :  { %p984_p8 = por %p983_p7, %p982_p6 }
  0x31   :  { %p985_p9 = pnand %p984_p8, %p978_p5 }
  0x33   :  { %988 = shalt.err (!%p985_p9)
}
  0x34   :  { %50 = dma.hbm_to_vmem [thread:$0]  %s1211_s2, 2048, %s45_s23, [#allocation6], %s1043_s9, %s1043_s9, %s1044_s10  }
  0x35   :  { %s989_s15 = scalar_lea.hbm %s1213_s4, 4096 }
  0x36   :  { %p990_p10 = scmp.ne.s32.totalorder %s1213_s4, %s989_s15  ;;  %p993_p11 = scmp.lt.u32.totalorder %s989_s15, %s1213_s4 }
  0x38   :  { %p995_p12 = pnand %p993_p11, %p990_p10 }
  0x3a   :  { %998 = shalt.err (!%p995_p12)
}
  0x3b   :  { %s999_s20 = scalar_lea.vmem %s1122_s26, 4096  ;;  %p1004_p0 = scmp.lt.s32.totalorder %s1122_s26, %s1122_s26 }
  0x3c   :  { %p1000_p13 = scmp.ne.s32.totalorder %s1122_s26, %s999_s20  ;;  %p1005_p1 = scmp.lt.s32.totalorder %s999_s20, %s999_s20 }
  0x3e   :  { %p1006_p2 = por %p1005_p1, %p1004_p0 }
  0x40   :  { %p1007_p3 = pnand %p1006_p2, %p1000_p13 }
  0x42   :  { %1010 = shalt.err (!%p1007_p3)
}
  0x43   :  { %64 = dma.hbm_to_vmem [thread:$0]  %s1213_s4, 4096, %s1122_s26, [#allocation9], %s1043_s9, %s1043_s9, %s1044_s10  }
  0x44   :  { %1033 = dma.done.wait [#allocation3], 768  }
  0x45   :  { %1034 = vsyncadd [#allocation3], 4294966528 }
  0x46   :  { %1035 = dma.done.wait [#allocation6], 3072  }
  0x47   :  { %1036 = vsyncadd [#allocation6], 4294964224 }
  0x48   :  { %1037 = dma.done.wait [#allocation9], 4096  }
  0x49   :  { %1038 = vsyncadd [#allocation9], 4294963200  ;;  %v87_v0 = vld [vmem:[#allocation7 + $0x60] sm:$0xff]  ;;  %v88_v1 = vld [vmem:[#allocation7 + $0x68] sm:$0xff]  ;;  %vm129_vm0 = vcmask 261120   ;;  %s1047_s21 = smov 64   ;;  %v125_v26 = vlaneseq }
  0x4a   :  { %v89_v2 = vld [vmem:[#allocation7 + $0x70] sm:$0xff]  ;;  %v908_v3 = vpack.i.bf16 %v88_v1, %v87_v0  ;;  %v90_v4 = vld [vmem:[#allocation7 + $0x78] sm:$0xff]  ;;  %v82_v9 = vld [vmem:[#allocation7 + $0x40] sm:$0xff]  ;;  %vm107_vm1 = vcmask 523264   ;;  %vm214_vm2 = vcmask 130048   ;;  %s1049_s30 = smov [#allocation10]  }
  0x4b   :  { %v79_v5 = vld [vmem:[#allocation2] sm:$0xff]  ;;  %v913_v6 = vpack.i.bf16 %v90_v4, %v89_v2  ;;  %v83_v10 = vld [vmem:[#allocation7 + $0x48] sm:$0xff]  ;;  %v85_v18 = vld [vmem:[#allocation7 + $0x58] sm:$0xff]  ;;  %v126_v27 = vshrl.u32 %v125_v26, 7  ;;  %s697_s7 = sshll.u32 %s1049_s30, 4  ;;  %s698_s7 = int_to_ptr.vmem [resolvable:$true] %s697_s7 }
  0x4c   :  { %909 = vrot.lane.b32.xlu0 %v908_v3, %s1047_s21  ;;  %777 = vmatprep.mubr.msk.f32.mxu0 %vm129_vm0, %v79_v5  ;;  %v713_v7 = vld [vmem:[%s1212_s3 + $0x3] ss:$0 sm:$0xff]  ;;  %v80_v24 = vld [vmem:[#allocation2 + $0x8] sm:$0xff]  ;;  %v212_v25 = vld [vmem:[#allocation5 + $0x20] sm:$0xff]  ;;  %p1016_p5 = scmp.lt.s32.totalorder %s698_s7, %s698_s7 }
  0x4d   :  { %121 = vrot.lane.b32.xlu1 %v713_v7, %s1047_s21  ;;  %v84_v17 = vld [vmem:[#allocation7 + $0x50] sm:$0xff]  ;;  %784 = vmatprep.mubr.msk.f32.mxu1 %vm214_vm2, %v212_v25  ;;  %v127_v30 = vsub.s32 0, %v126_v27  ;;  %v396_v36 = vld [vmem:[#allocation8] sm:$0xff]  ;;  %v397_v37 = vld [vmem:[#allocation8 + $0x8] sm:$0xff] }
  0x4e   :  { %v711_v29 = vld [vmem:[%s1212_s3 + $0x2] sm:$0x1]  ;;  %v859_v40 = vpack.c.bf16 %v397_v37, %v396_v36  ;;  %v399_v41 = vld [vmem:[#allocation8 + $0x18] sm:$0xff]  ;;  %v400_v43 = vld [vmem:[#allocation8 + $0x20] sm:$0xff]  ;;  %s1048_s3 = smov 16  }
  0x4f   :  { %v398_v38 = vld [vmem:[#allocation8 + $0x10] sm:$0xff]  ;;  %v401_v44 = vld [vmem:[#allocation8 + $0x28] sm:$0xff]  ;;  %v403_v51 = vld [vmem:[#allocation8 + $0x38] sm:$0xff] }
  0x50   :  { %914 = vrot.lane.b32.xlu0 %v913_v6, %s1047_s21  ;;  %v863_v42 = vpack.c.bf16 %v399_v41, %v398_v38  ;;  %v867_v47 = vpack.c.bf16 %v401_v44, %v400_v43  ;;  %v213_v48 = vld [vmem:[#allocation5 + $0x28] sm:$0xff]  ;;  %v301_v49 = vld [vmem:[#allocation5 + $0x30] sm:$0xff]  ;;  %v493_v54 = vld [vmem:[#allocation8 + $0x40] sm:$0xff] }
  0x51   :  { %v402_v50 = vld [vmem:[#allocation8 + $0x30] sm:$0xff]  ;;  %v494_v55 = vld [vmem:[#allocation8 + $0x48] sm:$0xff]  ;;  %v496_v61 = vld [vmem:[#allocation8 + $0x58] sm:$0xff] }
  0x52   :  { %v871_v52 = vpack.c.bf16 %v403_v51, %v402_v50  ;;  %v875_v59 = vpack.c.bf16 %v494_v55, %v493_v54  ;;  %v495_v60 = vld [vmem:[#allocation8 + $0x50] sm:$0xff]  ;;  %v302_v62 = vld [vmem:[#allocation5 + $0x38] sm:$0xff]  ;;  %v497_v0 = vld [vmem:[#allocation8 + $0x60] sm:$0xff] }
  0x53   :  { %v879_v63 = vpack.c.bf16 %v496_v61, %v495_v60  ;;  %v498_v1 = vld [vmem:[#allocation8 + $0x68] sm:$0xff]  ;;  %v499_v3 = vld [vmem:[#allocation8 + $0x70] sm:$0xff]  ;;  %v500_v4 = vld [vmem:[#allocation8 + $0x78] sm:$0xff] }
  0x54   :  { %v883_v2 = vpack.c.bf16 %v498_v1, %v497_v0  ;;  %v887_v5 = vpack.c.bf16 %v500_v4, %v499_v3  ;;  %v593_v6 = vld [vmem:[#allocation5 + $0x10] sm:$0xff]  ;;  %v594_v7 = vld [vmem:[#allocation5 + $0x18] sm:$0xff] }
  0x55   :  { %597 = vrot.lane.b32.xlu0 %v593_v6, %s1048_s3 }
  0xbe   :  { %v910_v8 = vpop.permute.xlu0 %909 }
  0xbf   :  { %v912_v11 = vunpack.i.h.bf16 %v910_v8  ;;  %v911_v12 = vunpack.i.l.bf16 %v910_v8  ;;  %v122_v28 = vpop.permute.xlu1 %121 }
  0xc0   :  { %v124_v31 = vsel %vm107_vm1, %v711_v29, %v122_v28  ;;  %v724_v29 = vld [vmem:[%s1214_s5 + $0x1] ss:$0 sm:$0xff] }
  0xc1   :  { %v108_v13 = vsel %vm107_vm1, %v82_v9, %v911_v12  ;;  %v109_v14 = vsel %vm107_vm1, %v83_v10, %v912_v11  ;;  %v128_v32 = vrot.slane %v124_v31, %v127_v30 }
  0xc2   :  { %v915_v15 = vpop.permute.xlu0 %914  ;;  %v843_v16 = vpack.c.bf16 %v109_v14, %v108_v13 }
  0xc3   :  { %v917_v19 = vunpack.i.h.bf16 %v915_v15  ;;  %v916_v20 = vunpack.i.l.bf16 %v915_v15 }
  0xc4   :  { %844 = vmatprep.subr.bf16.mxu0 %v843_v16 }
  0xc5   :  { %846 = vmatpush3.bf16.msra.mxu0 %v843_v16  ;;  %v110_v21 = vsel %vm107_vm1, %v84_v17, %v916_v20  ;;  %v111_v22 = vsel %vm107_vm1, %v85_v18, %v917_v19  ;;  %v590_v20 = vld [vmem:[#allocation5] sm:$0xff] }
  0xc6   :  { %v847_v23 = vpack.c.bf16 %v111_v22, %v110_v21  ;;  %v720_v22 = vld [vmem:[%s1214_s5] ss:$0 sm:$0xff]  ;;  %s1011_s5 = scalar_lea.vmem %s698_s7, 256 }
  0xc7   :  { %v598_v21 = vpop.permute.xlu0 %597  ;;  %p1012_p4 = scmp.ne.s32.totalorder %s698_s7, %s1011_s5  ;;  %p1017_p6 = scmp.lt.s32.totalorder %s1011_s5, %s1011_s5 }
  0xc8   :  { %848 = vmatprep.subr.bf16.mxu0 %v847_v23 }
  0xc9   :  { %850 = vmatpush3.bf16.msra.mxu0 %v847_v23  ;;  %v603_v23 = vsel %vm214_vm2, %v590_v20, %v598_v21  ;;  %p1018_p7 = por %p1017_p6, %p1016_p5 }
  0xca   :  { %860 = vmatprep.subr.bf16.mxu0 %v859_v40 }
  0xcb   :  { %p1019_p8 = pnand %p1018_p7, %p1012_p4 }
  0xcc   :  { %778 = vmatmul.mubr.msk.f32.vlgmr.msra.gmra.mrb[0].mxu0 %vm129_vm0, %v80_v24 }
  0xcd   :  { %862 = vmatpush3.bf16.msra.mxu0 %v859_v40 }
  0xce   :  { %864 = vmatprep.subr.bf16.mxu0 %v863_v42 }
  0xd1   :  { %866 = vmatpush3.bf16.msra.mxu0 %v863_v42 }
  0xd2   :  { %868 = vmatprep.subr.bf16.mxu0 %v867_v47 }
  0xd5   :  { %870 = vmatpush3.bf16.msra.mxu0 %v867_v47 }
  0xd6   :  { %872 = vmatprep.subr.bf16.mxu0 %v871_v52 }
  0xd9   :  { %874 = vmatpush3.bf16.msra.mxu0 %v871_v52 }
 0x19f   :  { %v779_v33 = vpop.f32.mrb[0].mxu0 }
 0x1a0   :  { %v208_v34 = vadd.f32 %v779_v33, %v128_v32  ;;  %v202_v35 = vpop.f32.mrb[1].mxu0 }
 0x1a1   :  { %v203_v39 = vadd.f32 %v202_v35, %v128_v32  ;;  %v591_v35 = vld [vmem:[#allocation5 + $0x8] sm:$0xff] }
 0x1a3   :  { %v918_v45 = vpack.i.bf16 %v208_v34, %v203_v39  ;;  %v851_v46 = vpack.c.bf16 %v208_v34, %v203_v39 }
 0x1a5   :  { %919 = vrot.lane.b32.xlu1 %v918_v45, %s1047_s21  ;;  %852 = vmatprep.subr.bf16.mxu1 %v851_v46 }
 0x1a6   :  { %854 = vmatpush3.bf16.msra.mxu1 %v851_v46 }
 0x1a9   :  { %785 = vmatmul.mubr.msk.f32.vlgmr.msra.gmra.mrb[0].mxu1 %vm214_vm2, %v213_v48  ;;  %599 = vrot.lane.b32.xlu1 %v594_v7, %s1048_s3 }
 0x1aa   :  { %791 = vmatprep.mubr.msk.f32.mxu1 %vm214_vm2, %v301_v49 }
 0x217   :  { %v920_v53 = vpop.permute.xlu1 %919 }
 0x218   :  { %v922_v56 = vunpack.i.h.bf16 %v920_v53  ;;  %v921_v57 = vunpack.i.l.bf16 %v920_v53 }
 0x21a   :  { %v855_v58 = vpack.c.bf16 %v922_v56, %v921_v57 }
 0x21b   :  { %v600_v36 = vpop.permute.xlu1 %599 }
 0x21c   :  { %856 = vmatprep.subr.bf16.mxu1 %v855_v58  ;;  %v604_v37 = vsel %vm214_vm2, %v591_v35, %v600_v36 }
 0x21d   :  { %858 = vmatpush3.bf16.msra.mxu1 %v855_v58 }
 0x21e   :  { %876 = vmatprep.subr.bf16.mxu1 %v875_v59 }
 0x220   :  { %792 = vmatmul.mubr.msk.f32.vlgmr.msra.gmra.mrb[2].mxu1 %vm214_vm2, %v302_v62 }
 0x221   :  { %878 = vmatpush3.bf16.msra.mxu1 %v875_v59 }
 0x222   :  { %880 = vmatprep.subr.bf16.mxu1 %v879_v63 }
 0x225   :  { %882 = vmatpush3.bf16.msra.mxu1 %v879_v63 }
 0x226   :  { %884 = vmatprep.subr.bf16.mxu1 %v883_v2 }
 0x229   :  { %886 = vmatpush3.bf16.msra.mxu1 %v883_v2 }
 0x22a   :  { %888 = vmatprep.subr.bf16.mxu1 %v887_v5 }
 0x22d   :  { %890 = vmatpush3.bf16.msra.mxu1 %v887_v5 }
 0x27c   :  { %v786_v8 = vpop.f32.mrb[0].mxu1 }
 0x27d   :  { %v297_v9 = vmul.f32 0.01, %v786_v8  ;;  %v287_v10 = vpop.f32.mrb[1].mxu1 }
 0x27e   :  { %v296_v11 = vmul.f32 0.01, %v287_v10 }
 0x27f   :  { %v299_v12 = vmax.f32 %v786_v8, %v297_v9 }
 0x280   :  { %v298_v13 = vmax.f32 %v287_v10, %v296_v11 }
 0x282   :  { %810 = vmatprep.mubr.msk.f32.mxu0 %vm107_vm1, %v298_v13 }
 0x283   :  { %811 = vmatmul.mubr.msk.f32.vlgmr.msra.gmra.mrb[2].mxu0 %vm107_vm1, %v299_v12 }
 0x284   :  { %840 = vmatprep.mubr.msk.f32.mxu0 %vm129_vm0, %v603_v23 }
 0x2f3   :  { %v793_v14 = vpop.f32.mrb[2].mxu1 }
 0x2f4   :  { %v393_v15 = vmul.f32 0.01, %v793_v14  ;;  %v383_v16 = vpop.f32.mrb[3].mxu1 }
 0x2f5   :  { %v392_v17 = vmul.f32 0.01, %v383_v16 }
 0x2f6   :  { %v395_v19 = vmax.f32 %v793_v14, %v393_v15 }
 0x2f7   :  { %v394_v18 = vmax.f32 %v383_v16, %v392_v17 }
 0x2f9   :  { %829 = vmatprep.mubr.msk.f32.mxu1 %vm107_vm1, %v394_v18 }
 0x2fa   :  { %830 = vmatmul.mubr.msk.f32.vlgmr.msra.gmra.mrb[4].mxu1 %vm107_vm1, %v395_v19 }
 0x356   :  { %v812_v24 = vpop.f32.mrb[2].mxu0 }
 0x357   :  { %v489_v25 = vadd.f32 %v812_v24, %v720_v22  ;;  %v483_v26 = vpop.f32.mrb[3].mxu0 }
 0x358   :  { %v484_v27 = vadd.f32 %v720_v22, %v483_v26 }
 0x35a   :  { %v891_v28 = vpack.c.bf16 %v489_v25, %v484_v27 }
 0x35c   :  { %892 = vmatprep.subr.bf16.mxu0 %v891_v28 }
 0x35d   :  { %894 = vmatpush3.bf16.msra.mxu0 %v891_v28 }
 0x3cd   :  { %v831_v30 = vpop.f32.mrb[4].mxu1 }
 0x3ce   :  { %v587_v31 = vadd.f32 %v831_v30, %v724_v29  ;;  %v581_v32 = vpop.f32.mrb[5].mxu1 }
 0x3cf   :  { %v582_v33 = vadd.f32 %v724_v29, %v581_v32 }
 0x3d1   :  { %v895_v34 = vpack.c.bf16 %v587_v31, %v582_v33 }
 0x3d3   :  { %896 = vmatprep.subr.bf16.mxu0 %v895_v34 }
 0x3d4   :  { %898 = vmatpush3.bf16.msra.mxu0 %v895_v34 }
 0x3d7   :  { %841 = vmatmul.mubr.msk.f32.vlgmr.msra.gmra.mrb[4].mxu0 %vm129_vm0, %v604_v37 }
 0x4aa   :  { %v842_v38 = vpop.f32.mrb[4].mxu0 }
 0x4ab   :  { %v687_v39 = vmul.f32 0.01, %v842_v38  ;;  %v677_v40 = vpop.f32.mrb[5].mxu0 }
 0x4ac   :  { %v686_v41 = vmul.f32 0.01, %v677_v40 }
 0x4ad   :  { %v689_v42 = vmax.f32 %v842_v38, %v687_v39 }
 0x4ae   :  { %v688_v43 = vmax.f32 %v677_v40, %v686_v41 }
 0x4af   :  { %691 = vst [vmem:[#allocation10 + $0x8] sm:$0xff] %v689_v42 }
 0x4b0   :  { %690 = vst [vmem:[#allocation10] sm:$0xff] %v688_v43 }
 0x4b1   :  { %1022 = shalt.err (!%p1019_p8)
}
 0x4b2   :  { %s1023_s0 = scalar_lea.hbm %s1215_s6, 256 }
 0x4b3   :  { %p1024_p9 = scmp.ne.s32.totalorder %s1215_s6, %s1023_s0  ;;  %p1027_p10 = scmp.lt.u32.totalorder %s1023_s0, %s1215_s6 }
 0x4b5   :  { %p1029_p11 = pnand %p1027_p10, %p1024_p9 }
 0x4b7   :  { %1032 = shalt.err (!%p1029_p11)
}
 0x4b8   :  { %703 = dma.vmem_to_hbm [thread:$0]  %s698_s7, 256, %s1215_s6, [#allocation4], %s1043_s9, %s1043_s9, %s1044_s10  }
 0x4b9   :  { %1039 = dma.done.wait [#allocation4], 256  }
 0x4ba   :  { %1040 = vsyncadd [#allocation4], 4294967040 }
 0x4bb   :  { %707 = vsyncpa [#allocation3], 1 }
 0x4bc   :  { %708 = vsyncpa [#allocation6], 1 }
 0x4bd   :  { %709 = vsyncpa [#allocation9], 1 }
 0x4be   :  { %710 = vsyncpa [#allocation4], 1 }

</bundles_post_ra>
